<compile_context>
chip_gen: v5e
topology: v5e:2x2
jax: 0.10.0
libtpu: 0.0.40
codegen_flags: <defaults>
</compile_context>

<pallas_src>
import functools

import jax
import jax.numpy as jnp
from jax.experimental import pallas as pl
from jax.experimental.pallas import tpu as pltpu

IN_F, HID_F, OUT_F = 11, 8, 3  # fc1: Linear(11, 8), fc3: Linear(8, 3)


def _round_up(x, m):
    return ((x + m - 1) // m) * m


def mlp_kernel(x_ref, w1_ref, b1_ref, w2_ref, b2_ref, o_ref):
    # x_ref:  (TB, IN_F)   batch tile, natural feature width (no HBM padding)
    # w1_ref: (IN_F, HID_F), b1_ref: (1, HID_F)
    # w2_ref: (HID_F, OUT_F), b2_ref: (1, OUT_F)   -- all pinned (constant index_map)
    # o_ref:  (TB, OUT_F)  natural-width output tile
    x = x_ref[...]
    h = jnp.dot(x, w1_ref[...], preferred_element_type=jnp.float32) + b1_ref[...]
    h = jnp.maximum(h, 0.0)                                   # fc1 + bias + ReLU
    y = jnp.dot(h, w2_ref[...], preferred_element_type=jnp.float32) + b2_ref[...]
    o_ref[...] = y.astype(o_ref.dtype)                        # fc3 + bias


@functools.partial(jax.jit, static_argnames=("tb",))
def mlp_forward(x, w1, b1, w2, b2, *, tb=4096):
    """x: (B, 11) f32; w1:(11,8) b1:(1,8) w2:(8,3) b2:(1,3) -> (B, 3) f32."""
    B = x.shape[0]
    x = x.astype(jnp.float32)

    # Batch tile: large enough to amortize the ~0.35us per-grid-step overhead,
    # small enough to fit every generation's scoped-VMEM budget, and <= half the
    # batch (rounded to sublanes) so the grid has >= 2 steps whenever B > 8 and
    # both TensorCores on v7x get work.
    half = _round_up(max((B + 1) // 2, 1), 8)
    TB = max(8, min(tb, half))
    Bp = _round_up(B, TB)
    if Bp != B:
        x = jnp.pad(x, ((0, Bp - B), (0, 0)))   # single pad on the batch axis only

    grid = (Bp // TB,)
    param_bytes = 4 * (w1.size + b1.size + w2.size + b2.size)
    cost = pl.CostEstimate(
        flops=2 * Bp * (IN_F * HID_F + HID_F * OUT_F),
        transcendentals=0,
        bytes_accessed=int(4 * Bp * IN_F + param_bytes + 4 * Bp * OUT_F),
    )

    out = pl.pallas_call(
        mlp_kernel,
        out_shape=jax.ShapeDtypeStruct((Bp, OUT_F), jnp.float32),
        grid=grid,
        in_specs=[
            pl.BlockSpec((TB, IN_F), lambda i: (i, 0)),       # batch-tiled activations
            pl.BlockSpec((IN_F, HID_F), lambda i: (0, 0)),    # pinned weights/biases
            pl.BlockSpec((1, HID_F), lambda i: (0, 0)),
            pl.BlockSpec((HID_F, OUT_F), lambda i: (0, 0)),
            pl.BlockSpec((1, OUT_F), lambda i: (0, 0)),
        ],
        out_specs=pl.BlockSpec((TB, OUT_F), lambda i: (i, 0)),
        compiler_params=pltpu.CompilerParams(
            dimension_semantics=(pltpu.PARALLEL,),            # shard batch steps across TCs
            vmem_limit_bytes=32 * 1024 * 1024,                # >= default on v6e/v7x, lifts v5e's 16 MiB
        ),
        cost_estimate=cost,
    )(x, w1, b1, w2, b2)

    return out[:B]


def init_linear_params(key, in_features, out_features):
    # Deterministic init mimicking torch.nn.Linear default:
    # U(-1/sqrt(in_features), 1/sqrt(in_features)) for both weight and bias.
    kw, kb = jax.random.split(key)
    bound = 1.0 / (in_features ** 0.5)
    # Stored as (in, out) — the transpose of PyTorch's (out, in) weight layout.
    w = jax.random.uniform(kw, (in_features, out_features), jnp.float32,
                           minval=-bound, maxval=bound)
    b = jax.random.uniform(kb, (1, out_features), jnp.float32,
                           minval=-bound, maxval=bound)
    return w, b


if __name__ == "__main__":
    key = jax.random.PRNGKey(0)
    k_x, k_x2, k_fc1, k_fc3 = jax.random.split(key, 4)

    w1, b1 = init_linear_params(k_fc1, IN_F, HID_F)   # fc1: Linear(11, 8)
    w2, b2 = init_linear_params(k_fc3, HID_F, OUT_F)  # fc3: Linear(8, 3)

    def ref_forward(x):
        return jnp.maximum(x @ w1 + b1, 0.0) @ w2 + b2

    # Small aligned batch (grid of 2 steps, TB=32).
    B = 64
    x = jax.random.normal(k_x, (B, IN_F), dtype=jnp.float32)
    out = jax.block_until_ready(mlp_forward(x, w1, b1, w2, b2))
    assert out.shape == (B, OUT_F)
    assert jnp.allclose(out, ref_forward(x), atol=1e-5, rtol=1e-5)

    # Ragged batch (exercises batch padding / slicing; grid of 2 steps, TB=8).
    B2 = 10
    x2 = jax.random.normal(k_x2, (B2, IN_F), dtype=jnp.float32)
    out2 = jax.block_until_ready(mlp_forward(x2, w1, b1, w2, b2))
    assert out2.shape == (B2, OUT_F)
    assert jnp.allclose(out2, ref_forward(x2), atol=1e-5, rtol=1e-5)

    print("KERNEL_OK")
</pallas_src>

<mosaic_0001>
module attributes {stable_mosaic.version = 11 : i64} {
  func.func @mlp_kernel(%arg0: i32, %arg1: memref<32x11xf32, #tpu.memory_space<vmem>>, %arg2: memref<11x8xf32, #tpu.memory_space<vmem>>, %arg3: memref<1x8xf32, #tpu.memory_space<vmem>>, %arg4: memref<8x3xf32, #tpu.memory_space<vmem>>, %arg5: memref<1x3xf32, #tpu.memory_space<vmem>>, %arg6: memref<32x3xf32, #tpu.memory_space<vmem>>) attributes {dimension_semantics = [#tpu.dimension_semantics<parallel>], iteration_bounds = array<i64: 2>, scalar_prefetch = 0 : i64, scratch_operands = 0 : i64, tpu.core_type = #tpu.core_type<tc>, window_params = [{transform_indices = @transform_0, window_bounds = array<i64: 32, 11>}, {pipeline_mode = #tpu.pipeline_mode<synchronous>, transform_indices = @transform_1, window_bounds = array<i64: 11, 8>}, {pipeline_mode = #tpu.pipeline_mode<synchronous>, transform_indices = @transform_2, window_bounds = array<i64: 1, 8>}, {pipeline_mode = #tpu.pipeline_mode<synchronous>, transform_indices = @transform_3, window_bounds = array<i64: 8, 3>}, {pipeline_mode = #tpu.pipeline_mode<synchronous>, transform_indices = @transform_4, window_bounds = array<i64: 1, 3>}, {transform_indices = @transform_5, window_bounds = array<i64: 32, 3>}]} {
    %c0 = arith.constant 0 : index
    %c0_0 = arith.constant 0 : index
    %0 = vector.load %arg1[%c0, %c0_0] : memref<32x11xf32, #tpu.memory_space<vmem>>, vector<32x11xf32>
    %c0_1 = arith.constant 0 : index
    %c0_2 = arith.constant 0 : index
    %1 = vector.load %arg2[%c0_1, %c0_2] : memref<11x8xf32, #tpu.memory_space<vmem>>, vector<11x8xf32>
    %cst = arith.constant dense<0.000000e+00> : vector<32x8xf32>
    %2 = tpu.matmul %0, %1, %cst {dimension_numbers = #tpu.dot_dimension_numbers<[1], [0], [0], [1], [0, 0, 1, 1], [], []>} : vector<32x11xf32>, vector<11x8xf32>, vector<32x8xf32> -> vector<32x8xf32>
    %c0_3 = arith.constant 0 : index
    %c0_4 = arith.constant 0 : index
    %3 = vector.load %arg3[%c0_3, %c0_4] : memref<1x8xf32, #tpu.memory_space<vmem>>, vector<1x8xf32>
    %4 = vector.broadcast %3 : vector<1x8xf32> to vector<32x8xf32>
    %5 = arith.addf %2, %4 : vector<32x8xf32>
    %cst_5 = arith.constant 0.000000e+00 : f32
    %6 = vector.broadcast %cst_5 : f32 to vector<32x8xf32>
    %7 = arith.maximumf %5, %6 : vector<32x8xf32>
    %c0_6 = arith.constant 0 : index
    %c0_7 = arith.constant 0 : index
    %8 = vector.load %arg4[%c0_6, %c0_7] : memref<8x3xf32, #tpu.memory_space<vmem>>, vector<8x3xf32>
    %cst_8 = arith.constant dense<0.000000e+00> : vector<32x3xf32>
    %9 = tpu.matmul %7, %8, %cst_8 {dimension_numbers = #tpu.dot_dimension_numbers<[1], [0], [0], [1], [0, 0, 1, 1], [], []>} : vector<32x8xf32>, vector<8x3xf32>, vector<32x3xf32> -> vector<32x3xf32>
    %c0_9 = arith.constant 0 : index
    %c0_10 = arith.constant 0 : index
    %10 = vector.load %arg5[%c0_9, %c0_10] : memref<1x3xf32, #tpu.memory_space<vmem>>, vector<1x3xf32>
    %11 = vector.broadcast %10 : vector<1x3xf32> to vector<32x3xf32>
    %12 = arith.addf %9, %11 : vector<32x3xf32>
    %c0_11 = arith.constant 0 : index
    %c0_12 = arith.constant 0 : index
    %13 = vector.load %arg6[%c0_11, %c0_12] : memref<32x3xf32, #tpu.memory_space<vmem>>, vector<32x3xf32>
    tpu.vector_store %arg6[%c0_11, %c0_12], %12 {strides = array<i32>} : memref<32x3xf32, #tpu.memory_space<vmem>>, vector<32x3xf32>,
    return
  }
  func.func @transform_0(%arg0: i32) -> (i32, i32) {
    %c0_i32 = arith.constant 0 : i32
    %c0_i32_0 = arith.constant 0 : i32
    return %arg0, %c0_i32 : i32, i32
  }
  func.func @transform_1(%arg0: i32) -> (i32, i32) {
    %c0_i32 = arith.constant 0 : i32
    %c0_i32_0 = arith.constant 0 : i32
    %c0_i32_1 = arith.constant 0 : i32
    return %c0_i32, %c0_i32_0 : i32, i32
  }
  func.func @transform_2(%arg0: i32) -> (i32, i32) {
    %c0_i32 = arith.constant 0 : i32
    %c0_i32_0 = arith.constant 0 : i32
    %c0_i32_1 = arith.constant 0 : i32
    return %c0_i32, %c0_i32_0 : i32, i32
  }
  func.func @transform_3(%arg0: i32) -> (i32, i32) {
    %c0_i32 = arith.constant 0 : i32
    %c0_i32_0 = arith.constant 0 : i32
    %c0_i32_1 = arith.constant 0 : i32
    return %c0_i32, %c0_i32_0 : i32, i32
  }
  func.func @transform_4(%arg0: i32) -> (i32, i32) {
    %c0_i32 = arith.constant 0 : i32
    %c0_i32_0 = arith.constant 0 : i32
    %c0_i32_1 = arith.constant 0 : i32
    return %c0_i32, %c0_i32_0 : i32, i32
  }
  func.func @transform_5(%arg0: i32) -> (i32, i32) {
    %c0_i32 = arith.constant 0 : i32
    %c0_i32_0 = arith.constant 0 : i32
    return %arg0, %c0_i32 : i32, i32
  }
}

</mosaic_0001>

<bundles_post_ra>
// kernel: mlp_forward.1
= control target key start
LH: loop header
LB: loop body
LE: loop exit
PB: predicated region body
PF: predicated region fallthrough
CT: control target
= control target key end

     0   :  { %s467_s18 = smov 0   ;;  %s506_s0 = inlined_call_operand.vmem [shape: f32[64,11], index: 0, kind: input, shape index: {}]   ;;  %s507_s1 = inlined_call_operand.vmem [shape: f32[11,8], index: 1, kind: input, shape index: {}]   ;;  %s508_s2 = inlined_call_operand.vmem [shape: f32[1,8], index: 2, kind: input, shape index: {}]   ;;  %s509_s3 = inlined_call_operand.vmem [shape: f32[8,3], index: 3, kind: input, shape index: {}]   ;;  %s510_s4 = inlined_call_operand.vmem [shape: f32[1,3], index: 4, kind: input, shape index: {}]   ;;  %s511_s5 = inlined_call_operand.vmem [shape: f32[64,3], index: 5, kind: output, shape index: {}]  }
   0x1 LB: > { %s396_s19 = sadd.s32 4294967295, %s435_s18   ;;  %p400_p0 = scmp.ge.s32.totalorder %s435_s18, 1  ;;  %s435_s18 = sphi %s467_s18, %s15_s18  }
   0x2   : > { %p188_p1 = scmp.lt.s32.totalorder %s435_s18, 3 }
   0x4   : > { %p189_p2 = pnand %p400_p0, %p188_p1 }
   0x5   : > { %s401_s24 = sshll.u32 (!%p189_p2), %s396_s19, 2 }
   0x6   : > { %192 = sbr.rel (%p189_p2) target bundleno = 304 (0x130), region = 40  ;;  %p217_p3 = scmp.lt.s32.totalorder (!%p189_p2), %s401_s24, 7 }
   0xb   : > { %v233_v0 = vld [vmem:[%s507_s1 + $0x8] sm:$0x7]  ;;  %vm251_vm0 = vcmask 1042432   ;;  %v232_v1 = vld [vmem:[%s507_s1] sm:$0xff]  ;;  %s513_s24 = smov (!%p217_p3, %s401_s24), 7  ;;  %vm238_vm1 = vcmask 89088  }
   0xc   : > { %405 = vmatpush.msk.msra.mxu0 %vm251_vm0, %v233_v0  ;;  %416 = vmatpush.msk.msra.mxu2 %vm251_vm0, %v233_v0  ;;  %s402_s25 = sshll.u32 %s513_s24, 3  ;;  %v288_v6 = vld [vmem:[%s509_s3] sm:$0xff]  ;;  %vm293_vm2 = vcmask 64512   ;;  %vm335_vm3 = vcmask 23552  }
   0xd   : > { %s220_s28 = scalar_lea.vmem %s506_s0, %s402_s25  ;;  %321 = vmatpush.msra.mxu1 %v288_v6  ;;  %418 = vmatpush.msra.mxu3 %v288_v6  ;;  %v427_v7 = vld [vmem:[%s508_s2] ss:$0 sm:$0xff]  ;;  %s226_s12 = scalar_lea.vmem %s511_s5, %s402_s25 }
   0xe   : > { %270 = vmatpush.msra.mxu0 %v232_v1  ;;  %417 = vmatpush.msra.mxu2 %v232_v1  ;;  %v228_v2 = vld [vmem:[%s220_s28] sm:$0xff]  ;;  %v230_v3 = vld [vmem:[%s220_s28 + $0x10] sm:$0xff]  ;;  %v229_v4 = vld [vmem:[%s220_s28 + $0x8] sm:$0xff] }
   0xf   : > { %406 = vmatmul.msk.f32.vlgmr.msra.gmra.mxu0 %vm238_vm1, %v228_v2  ;;  %408 = vmatmul.msk.f32.vlgmr.msra.gmra.mxu2 %vm238_vm1, %v230_v3  ;;  %v231_v5 = vld [vmem:[%s220_s28 + $0x18] sm:$0xff]  ;;  %v428_v20 = vld [vmem:[%s510_s4] ss:$0 sm:$0xff] }
  0x17   : > { %407 = vmatmul.msk.f32.gmra.mxu0 %vm238_vm1, %v229_v4  ;;  %409 = vmatmul.msk.f32.gmra.mxu2 %vm238_vm1, %v231_v5 }
  0x8c   : > { %v272_v8 = vpop.f32.mrf.mxu0 }
  0x8d   : > { %v273_v9 = vadd.f32 %v427_v7, %v272_v8 }
  0x8f   : > { %v284_v10 = vmax.f32 %v273_v9, 0.0 }
  0x91   : > { %410 = vmatmul.msk.f32.vlgmr.msra.gmra.mxu1 %vm293_vm2, %v284_v10 }
  0x92   : > { %v278_v12 = vpop.f32.mrf.mxu2 }
  0x93   : > { %v279_v15 = vadd.f32 %v427_v7, %v278_v12 }
  0x94   : > { %v275_v11 = vpop.f32.mrf.mxu0 }
  0x95   : > { %v276_v13 = vadd.f32 %v427_v7, %v275_v11  ;;  %v286_v16 = vmax.f32 %v279_v15, 0.0 }
  0x97   : > { %v285_v14 = vmax.f32 %v276_v13, 0.0 }
  0x99   : > { %411 = vmatmul.msk.f32.vlgmr.msra.gmra.mxu3 %vm293_vm2, %v285_v14 }
  0x9a   : > { %v281_v17 = vpop.f32.mrf.mxu2 }
  0x9b   : > { %v282_v18 = vadd.f32 %v427_v7, %v281_v17 }
  0x9d   : > { %v287_v19 = vmax.f32 %v282_v18, 0.0 }
  0xa1   : > { %412 = vmatmul.msk.f32.gmra.mxu3 %vm293_vm2, %v286_v16 }
  0xa9   : > { %413 = vmatmul.msk.f32.gmra.mxu3 %vm293_vm2, %v287_v19 }
 0x10e   : > { %v323_v21 = vpop.f32.mrf.mxu1 }
 0x10f   : > { %v324_v22 = vadd.f32 %v428_v20, %v323_v21 }
 0x111   : > { %336 = vst.msk [vmem:[%s226_s12] sm:$0xff] %vm335_vm3, %v324_v22 }
 0x11c   : > { %v326_v23 = vpop.f32.mrf.mxu3 }
 0x11d   : > { %v327_v24 = vadd.f32 %v428_v20, %v326_v23 }
 0x11f   : > { %337 = vst.msk [vmem:[%s226_s12 + $0x8] sm:$0xff] %vm335_vm3, %v327_v24 }
 0x124   : > { %v329_v25 = vpop.f32.mrf.mxu3 }
 0x125   : > { %v330_v26 = vadd.f32 %v428_v20, %v329_v25 }
 0x127   : > { %338 = vst.msk [vmem:[%s226_s12 + $0x10] sm:$0xff] %vm335_vm3, %v330_v26 }
 0x12c   : > { %v332_v27 = vpop.f32.mrf.mxu3 }
 0x12d   : > { %v333_v28 = vadd.f32 %v428_v20, %v332_v27 }
 0x12f   : > { %339 = vst.msk [vmem:[%s226_s12 + $0x18] sm:$0xff] %vm335_vm3, %v333_v28 }
 0x130 PF: > { %s15_s18 = sadd.s32 1, %s435_s18  }
 0x131   : > { %p12_p4 = scmp.ge.s32.totalorder %s15_s18, 4  }
 0x133   :  { %14 = sbr.rel (!%p12_p4) target bundleno = 1 (0x1), region = 70 }

</bundles_post_ra>
